<compile_context>
chip_gen: v7x
topology: tpu7x:2x2x1
jax: 0.10.0
libtpu: 0.0.40
codegen_flags: <defaults>
</compile_context>

<pallas_src>
import functools
import math

import jax
import jax.numpy as jnp
from jax.experimental import pallas as pl
from jax.experimental.pallas import tpu as pltpu


def _round_up(x, m):
    return (x + m - 1) // m * m


def _layernorm_kernel(x_ref, a_ref, b_ref, o_ref, *, eps, features, group):
    """Block is (tile_rows, group*features); each row holds `group` independent
    feature vectors packed along the lane axis."""
    x = x_ref[...].astype(jnp.float32)                    # (T, group*F), lane-dense
    outs = []
    for g in range(group):                                 # small static unroll
        xs = x[:, g * features:(g + 1) * features]         # (T, F)
        mean = jnp.mean(xs, axis=-1, keepdims=True)        # (T, 1)
        centered = xs - mean
        # torch.std is unbiased (divides by N-1); features == 1 -> NaN, same as torch.
        var = jnp.sum(centered * centered, axis=-1, keepdims=True) / (features - 1)
        std = jnp.sqrt(var)
        # Narrow exact reciprocal column, then F-wide multiplies only.
        inv = 1.0 / (std + eps)
        outs.append(centered * inv)
    y = outs[0] if group == 1 else jnp.concatenate(outs, axis=-1)   # (T, group*F)
    o_ref[...] = (y * a_ref[...] + b_ref[...]).astype(o_ref.dtype)


def _vmem_capacity_bytes():
    try:
        return int(pltpu.get_tpu_info().vmem_capacity_bytes)
    except Exception:
        return 64 * 1024 * 1024   # conservative fallback: assume v7x-sized VMEM


def _pick_group(rows, features, max_group=16):
    """Fold `group` rows into lanes so the packed lane width is as lane-dense as
    possible (ideally a multiple of 128). Requires rows % group == 0."""
    if rows <= 1 or features % 128 == 0:
        return 1
    best_g = 1
    best_ratio = _round_up(features, 128) / features
    for g in range(2, max_group + 1):
        if rows % g:
            continue
        lane_width = g * features
        if lane_width > 1024:
            continue
        ratio = _round_up(lane_width, 128) / lane_width
        if ratio < best_ratio - 1e-9:
            best_g, best_ratio = g, ratio
    return best_g


def _pick_tile_rows(rows, features, group, dtype_bytes, vmem_budget_bytes,
                    max_io_block_bytes=8 * 1024 * 1024):
    """Rows per block (in packed rows), sized so the double-buffered I/O blocks
    plus the block-sized f32 temporaries fit the per-chip VMEM budget."""
    pack = max(8, 32 // dtype_bytes)              # 8 f32, 16 bf16, 32 int8
    lane_width = features * group
    io_lanes = _round_up(lane_width, 128)
    io_row = 4 * io_lanes * dtype_bytes           # in + out, each double-buffered
    # ~(group+4) block-sized f32 intermediates (x_f32, per-group outputs kept
    # alive until the concat, the concat result, the affine result).
    temp_row = (group + 4) * _round_up(features, 128) * 4
    tr = vmem_budget_bytes // max(1, io_row + temp_row)
    tr = min(tr, max_io_block_bytes // max(1, io_lanes * dtype_bytes))
    tr = max(pack, (tr // pack) * pack)
    # TODO(synk): for very large feature dims, split F across a second
    # ("arbitrary") grid axis with sum / sum-of-squares accumulators instead of
    # forcing one oversized block.
    return int(tr)


def layer_norm(x, a_2, b_2, eps=1e-7, *, tile_rows=None):
    """LayerNorm over the last axis of x (any rank >= 1)."""
    orig_shape = x.shape
    features = orig_shape[-1]
    rows = int(math.prod(orig_shape[:-1])) if len(orig_shape) > 1 else 1
    x2 = x.reshape(rows, features)

    dtype_bytes = jnp.dtype(x.dtype).itemsize
    pack = max(8, 32 // dtype_bytes)
    vmem_cap = _vmem_capacity_bytes()

    # --- lane packing: fold `group` rows into the lane axis ---------------
    group = _pick_group(rows, features)
    rows_p = rows // group
    lane_width = features * group
    xp = x2.reshape(rows_p, lane_width)

    # Params resident across the whole grid: f32, tiled to the packed width.
    a2 = jnp.tile(a_2.reshape(-1).astype(jnp.float32), (group,)).reshape(1, lane_width)
    b2 = jnp.tile(b_2.reshape(-1).astype(jnp.float32), (group,)).reshape(1, lane_width)

    # --- tile sizing (per-chip) --------------------------------------------
    if tile_rows is None:
        tile_rows = _pick_tile_rows(rows_p, features, group, dtype_bytes,
                                    vmem_budget_bytes=vmem_cap // 2)
    else:
        tile_rows = max(pack, (int(tile_rows) // pack) * pack)
    tile_rows = min(tile_rows, _round_up(rows_p, pack))
    if tile_rows >= rows_p:
        if rows_p >= 2 * pack:
            # keep >= 2 grid steps so the parallel axis shards over v7x's 2 TCs
            tile_rows = _round_up((rows_p + 1) // 2, pack)
        else:
            tile_rows = rows_p          # single full-height block (always legal)

    grid = (pl.cdiv(rows_p, tile_rows),)

    # --- VMEM budget: I/O double-buffers + f32 temporaries + params + slack ---
    io_lanes = _round_up(lane_width, 128)
    io_block = tile_rows * io_lanes * dtype_bytes
    temp_block = tile_rows * (group + 4) * _round_up(features, 128) * 4
    vmem_need = 4 * io_block + temp_block + 4 * io_lanes * 4 + (2 << 20)
    vmem_limit = int(min(max(vmem_need, 16 * 1024 * 1024),
                         min(int(vmem_cap * 0.75), 96 * 1024 * 1024)))

    out = pl.pallas_call(
        functools.partial(_layernorm_kernel, eps=eps, features=features, group=group),
        out_shape=jax.ShapeDtypeStruct((rows_p, lane_width), x.dtype),
        grid_spec=pltpu.PrefetchScalarGridSpec(
            num_scalar_prefetch=0,
            grid=grid,
            in_specs=[
                pl.BlockSpec((tile_rows, lane_width), lambda i: (i, 0)),
                pl.BlockSpec((1, lane_width), lambda i: (0, 0)),
                pl.BlockSpec((1, lane_width), lambda i: (0, 0)),
            ],
            out_specs=pl.BlockSpec((tile_rows, lane_width), lambda i: (i, 0)),
        ),
        compiler_params=pltpu.CompilerParams(
            dimension_semantics=("parallel",),
            vmem_limit_bytes=vmem_limit,
        ),
    )(xp, a2, b2)

    return out.reshape(orig_shape)


def layer_norm_ref(x, a_2, b_2, eps=1e-7):
    """Pure-JAX reference mirroring the PyTorch module."""
    mean = jnp.mean(x, axis=-1, keepdims=True)
    var = jnp.sum((x - mean) ** 2, axis=-1, keepdims=True) / (x.shape[-1] - 1)
    std = jnp.sqrt(var)
    return a_2 * (x - mean) / (std + eps) + b_2


if __name__ == "__main__":
    key = jax.random.PRNGKey(0)
    batch, seq, hidden = 2, 8, 32

    x = jax.random.normal(key, (batch, seq, hidden), dtype=jnp.float32)
    # Deterministic parameter init matching nn.Parameter(torch.ones/zeros(features))
    a_2 = jnp.ones((hidden,), dtype=jnp.float32)
    b_2 = jnp.zeros((hidden,), dtype=jnp.float32)

    out = layer_norm(x, a_2, b_2, eps=1e-7)
    out = jax.block_until_ready(out)

    ref = layer_norm_ref(x, a_2, b_2, eps=1e-7)
    assert out.shape == x.shape
    assert jnp.allclose(out, ref, atol=1e-5, rtol=1e-5), "mismatch vs reference"

    print("KERNEL_OK")
</pallas_src>

<mosaic_0001>
module attributes {stable_mosaic.version = 11 : i64} {
  func.func @_layernorm_kernel(%arg0: i32, %arg1: memref<4x128xf32, #tpu.memory_space<vmem>>, %arg2: memref<1x128xf32, #tpu.memory_space<vmem>>, %arg3: memref<1x128xf32, #tpu.memory_space<vmem>>, %arg4: memref<4x128xf32, #tpu.memory_space<vmem>>) attributes {dimension_semantics = [#tpu.dimension_semantics<parallel>], iteration_bounds = array<i64: 1>, scalar_prefetch = 0 : i64, scratch_operands = 0 : i64, tpu.core_type = #tpu.core_type<tc>, window_params = [{transform_indices = @transform_0, window_bounds = array<i64: 4, 128>}, {pipeline_mode = #tpu.pipeline_mode<synchronous>, transform_indices = @transform_1, window_bounds = array<i64: 1, 128>}, {pipeline_mode = #tpu.pipeline_mode<synchronous>, transform_indices = @transform_2, window_bounds = array<i64: 1, 128>}, {transform_indices = @transform_3, window_bounds = array<i64: 4, 128>}]} {
    %c0 = arith.constant 0 : index
    %c0_0 = arith.constant 0 : index
    %0 = vector.load %arg1[%c0, %c0_0] : memref<4x128xf32, #tpu.memory_space<vmem>>, vector<4x128xf32>
    %1 = vector.extract_strided_slice %0 {offsets = [0, 0], sizes = [4, 32], strides = [1, 1]} : vector<4x128xf32> to vector<4x32xf32>
    %cst = arith.constant dense<0.000000e+00> : vector<4xf32>
    %2 = vector.multi_reduction <add>, %1, %cst [1] : vector<4x32xf32> to vector<4xf32>
    %3 = vector.shape_cast %2 : vector<4xf32> to vector<4x1xf32>
    %cst_1 = arith.constant 3.200000e+01 : f32
    %4 = vector.broadcast %cst_1 : f32 to vector<4x1xf32>
    %5 = arith.divf %3, %4 : vector<4x1xf32>
    %6 = vector.broadcast %5 : vector<4x1xf32> to vector<4x32xf32>
    %7 = arith.subf %1, %6 : vector<4x32xf32>
    %8 = arith.mulf %7, %7 : vector<4x32xf32>
    %cst_2 = arith.constant dense<0.000000e+00> : vector<4xf32>
    %9 = vector.multi_reduction <add>, %8, %cst_2 [1] : vector<4x32xf32> to vector<4xf32>
    %10 = vector.shape_cast %9 : vector<4xf32> to vector<4x1xf32>
    %cst_3 = arith.constant 3.100000e+01 : f32
    %11 = vector.broadcast %cst_3 : f32 to vector<4x1xf32>
    %12 = arith.divf %10, %11 : vector<4x1xf32>
    %13 = math.sqrt %12 : vector<4x1xf32>
    %cst_4 = arith.constant 1.000000e-07 : f32
    %14 = vector.broadcast %cst_4 : f32 to vector<4x1xf32>
    %15 = arith.addf %13, %14 : vector<4x1xf32>
    %cst_5 = arith.constant 1.000000e+00 : f32
    %16 = vector.broadcast %cst_5 : f32 to vector<4x1xf32>
    %17 = arith.divf %16, %15 : vector<4x1xf32>
    %18 = vector.broadcast %17 : vector<4x1xf32> to vector<4x32xf32>
    %19 = arith.mulf %7, %18 : vector<4x32xf32>
    %20 = vector.extract_strided_slice %0 {offsets = [0, 32], sizes = [4, 32], strides = [1, 1]} : vector<4x128xf32> to vector<4x32xf32>
    %cst_6 = arith.constant dense<0.000000e+00> : vector<4xf32>
    %21 = vector.multi_reduction <add>, %20, %cst_6 [1] : vector<4x32xf32> to vector<4xf32>
    %22 = vector.shape_cast %21 : vector<4xf32> to vector<4x1xf32>
    %cst_7 = arith.constant 3.200000e+01 : f32
    %23 = vector.broadcast %cst_7 : f32 to vector<4x1xf32>
    %24 = arith.divf %22, %23 : vector<4x1xf32>
    %25 = vector.broadcast %24 : vector<4x1xf32> to vector<4x32xf32>
    %26 = arith.subf %20, %25 : vector<4x32xf32>
    %27 = arith.mulf %26, %26 : vector<4x32xf32>
    %cst_8 = arith.constant dense<0.000000e+00> : vector<4xf32>
    %28 = vector.multi_reduction <add>, %27, %cst_8 [1] : vector<4x32xf32> to vector<4xf32>
    %29 = vector.shape_cast %28 : vector<4xf32> to vector<4x1xf32>
    %cst_9 = arith.constant 3.100000e+01 : f32
    %30 = vector.broadcast %cst_9 : f32 to vector<4x1xf32>
    %31 = arith.divf %29, %30 : vector<4x1xf32>
    %32 = math.sqrt %31 : vector<4x1xf32>
    %cst_10 = arith.constant 1.000000e-07 : f32
    %33 = vector.broadcast %cst_10 : f32 to vector<4x1xf32>
    %34 = arith.addf %32, %33 : vector<4x1xf32>
    %cst_11 = arith.constant 1.000000e+00 : f32
    %35 = vector.broadcast %cst_11 : f32 to vector<4x1xf32>
    %36 = arith.divf %35, %34 : vector<4x1xf32>
    %37 = vector.broadcast %36 : vector<4x1xf32> to vector<4x32xf32>
    %38 = arith.mulf %26, %37 : vector<4x32xf32>
    %39 = vector.extract_strided_slice %0 {offsets = [0, 64], sizes = [4, 32], strides = [1, 1]} : vector<4x128xf32> to vector<4x32xf32>
    %cst_12 = arith.constant dense<0.000000e+00> : vector<4xf32>
    %40 = vector.multi_reduction <add>, %39, %cst_12 [1] : vector<4x32xf32> to vector<4xf32>
    %41 = vector.shape_cast %40 : vector<4xf32> to vector<4x1xf32>
    %cst_13 = arith.constant 3.200000e+01 : f32
    %42 = vector.broadcast %cst_13 : f32 to vector<4x1xf32>
    %43 = arith.divf %41, %42 : vector<4x1xf32>
    %44 = vector.broadcast %43 : vector<4x1xf32> to vector<4x32xf32>
    %45 = arith.subf %39, %44 : vector<4x32xf32>
    %46 = arith.mulf %45, %45 : vector<4x32xf32>
    %cst_14 = arith.constant dense<0.000000e+00> : vector<4xf32>
    %47 = vector.multi_reduction <add>, %46, %cst_14 [1] : vector<4x32xf32> to vector<4xf32>
    %48 = vector.shape_cast %47 : vector<4xf32> to vector<4x1xf32>
    %cst_15 = arith.constant 3.100000e+01 : f32
    %49 = vector.broadcast %cst_15 : f32 to vector<4x1xf32>
    %50 = arith.divf %48, %49 : vector<4x1xf32>
    %51 = math.sqrt %50 : vector<4x1xf32>
    %cst_16 = arith.constant 1.000000e-07 : f32
    %52 = vector.broadcast %cst_16 : f32 to vector<4x1xf32>
    %53 = arith.addf %51, %52 : vector<4x1xf32>
    %cst_17 = arith.constant 1.000000e+00 : f32
    %54 = vector.broadcast %cst_17 : f32 to vector<4x1xf32>
    %55 = arith.divf %54, %53 : vector<4x1xf32>
    %56 = vector.broadcast %55 : vector<4x1xf32> to vector<4x32xf32>
    %57 = arith.mulf %45, %56 : vector<4x32xf32>
    %58 = vector.extract_strided_slice %0 {offsets = [0, 96], sizes = [4, 32], strides = [1, 1]} : vector<4x128xf32> to vector<4x32xf32>
    %cst_18 = arith.constant dense<0.000000e+00> : vector<4xf32>
    %59 = vector.multi_reduction <add>, %58, %cst_18 [1] : vector<4x32xf32> to vector<4xf32>
    %60 = vector.shape_cast %59 : vector<4xf32> to vector<4x1xf32>
    %cst_19 = arith.constant 3.200000e+01 : f32
    %61 = vector.broadcast %cst_19 : f32 to vector<4x1xf32>
    %62 = arith.divf %60, %61 : vector<4x1xf32>
    %63 = vector.broadcast %62 : vector<4x1xf32> to vector<4x32xf32>
    %64 = arith.subf %58, %63 : vector<4x32xf32>
    %65 = arith.mulf %64, %64 : vector<4x32xf32>
    %cst_20 = arith.constant dense<0.000000e+00> : vector<4xf32>
    %66 = vector.multi_reduction <add>, %65, %cst_20 [1] : vector<4x32xf32> to vector<4xf32>
    %67 = vector.shape_cast %66 : vector<4xf32> to vector<4x1xf32>
    %cst_21 = arith.constant 3.100000e+01 : f32
    %68 = vector.broadcast %cst_21 : f32 to vector<4x1xf32>
    %69 = arith.divf %67, %68 : vector<4x1xf32>
    %70 = math.sqrt %69 : vector<4x1xf32>
    %cst_22 = arith.constant 1.000000e-07 : f32
    %71 = vector.broadcast %cst_22 : f32 to vector<4x1xf32>
    %72 = arith.addf %70, %71 : vector<4x1xf32>
    %cst_23 = arith.constant 1.000000e+00 : f32
    %73 = vector.broadcast %cst_23 : f32 to vector<4x1xf32>
    %74 = arith.divf %73, %72 : vector<4x1xf32>
    %75 = vector.broadcast %74 : vector<4x1xf32> to vector<4x32xf32>
    %76 = arith.mulf %64, %75 : vector<4x32xf32>
    %77 = tpu.concatenate %19, %38, %57, %76 in 1 : vector<4x32xf32>, vector<4x32xf32>, vector<4x32xf32>, vector<4x32xf32> -> vector<4x128xf32>
    %c0_24 = arith.constant 0 : index
    %c0_25 = arith.constant 0 : index
    %78 = vector.load %arg2[%c0_24, %c0_25] : memref<1x128xf32, #tpu.memory_space<vmem>>, vector<1x128xf32>
    %79 = vector.broadcast %78 : vector<1x128xf32> to vector<4x128xf32>
    %80 = arith.mulf %77, %79 : vector<4x128xf32>
    %c0_26 = arith.constant 0 : index
    %c0_27 = arith.constant 0 : index
    %81 = vector.load %arg3[%c0_26, %c0_27] : memref<1x128xf32, #tpu.memory_space<vmem>>, vector<1x128xf32>
    %82 = vector.broadcast %81 : vector<1x128xf32> to vector<4x128xf32>
    %83 = arith.addf %80, %82 : vector<4x128xf32>
    %c0_28 = arith.constant 0 : index
    %c0_29 = arith.constant 0 : index
    %84 = vector.load %arg4[%c0_28, %c0_29] : memref<4x128xf32, #tpu.memory_space<vmem>>, vector<4x128xf32>
    tpu.vector_store %arg4[%c0_28, %c0_29], %83 {strides = array<i32>} : memref<4x128xf32, #tpu.memory_space<vmem>>, vector<4x128xf32>,
    return
  }
  func.func @transform_0(%arg0: i32) -> (i32, i32) {
    %c0_i32 = arith.constant 0 : i32
    %c0_i32_0 = arith.constant 0 : i32
    return %arg0, %c0_i32 : i32, i32
  }
  func.func @transform_1(%arg0: i32) -> (i32, i32) {
    %c0_i32 = arith.constant 0 : i32
    %c0_i32_0 = arith.constant 0 : i32
    %c0_i32_1 = arith.constant 0 : i32
    return %c0_i32, %c0_i32_0 : i32, i32
  }
  func.func @transform_2(%arg0: i32) -> (i32, i32) {
    %c0_i32 = arith.constant 0 : i32
    %c0_i32_0 = arith.constant 0 : i32
    %c0_i32_1 = arith.constant 0 : i32
    return %c0_i32, %c0_i32_0 : i32, i32
  }
  func.func @transform_3(%arg0: i32) -> (i32, i32) {
    %c0_i32 = arith.constant 0 : i32
    %c0_i32_0 = arith.constant 0 : i32
    return %arg0, %c0_i32 : i32, i32
  }
}

</mosaic_0001>

<bundles_post_ra>
// kernel: tpu_custom_call.1
= control target key start
LH: loop header
LB: loop body
LE: loop exit
PB: predicated region body
PF: predicated region fallthrough
CT: control target
= control target key end

     0   :  { %8 = vsyncpa [#allocation3], 0  ;;  %s329_s0 = inlined_call_operand.hbm [shape: f32[4,128], index: 0, kind: input, shape index: {}]   ;;  %s330_s1 = inlined_call_operand.vmem [shape: f32[1,128], index: 1, kind: input, shape index: {}]   ;;  %s331_s2 = inlined_call_operand.vmem [shape: f32[1,128], index: 2, kind: input, shape index: {}]   ;;  %s332_s3 = inlined_call_operand.hbm [shape: f32[4,128], index: 3, kind: output, shape index: {}]  }
   0x1   :  { %9 = vsyncpa [#allocation4], 0  ;;  %s246_s12 = smov [#allocation2]   ;;  %s198_s16 = scalar_lea.hbm %s329_s0, 64 }
   0x2   :  { %s16_s13 = sshll.u32 %s246_s12, 4  ;;  %p199_p0 = scmp.ne.s32.totalorder %s329_s0, %s198_s16  ;;  %s17_s13 = int_to_ptr.vmem [resolvable:$true] %s16_s13 }
   0x3   :  { %p202_p1 = scmp.lt.u32.totalorder %s198_s16, %s329_s0 }
   0x5   :  { %p204_p2 = pnand %p202_p1, %p199_p0 }
   0x7   :  { %207 = shalt.err (!%p204_p2)
}
   0x8   :  { %s208_s21 = scalar_lea.vmem %s17_s13, 64  ;;  %p213_p4 = scmp.lt.s32.totalorder %s17_s13, %s17_s13 }
   0x9   :  { %p209_p3 = scmp.ne.s32.totalorder %s17_s13, %s208_s21  ;;  %p214_p5 = scmp.lt.s32.totalorder %s208_s21, %s208_s21 }
   0xb   :  { %p215_p6 = por %p214_p5, %p213_p4 }
   0xd   :  { %p216_p7 = pnand %p215_p6, %p209_p3 }
   0xf   :  { %219 = shalt.err (!%p216_p7)
}
  0x10   :  { %19 = dma.hbm_to_vmem [thread:$0]  %s329_s0, 64, %s17_s13, [#allocation3]  }
  0x11   :  { %242 = dma.done.wait [#allocation3], 64  }
  0x12   :  { %243 = vsyncadd [#allocation3], 4294967232  ;;  %v27_v0 = vld [vmem:[#allocation2] sm:$0xf]  ;;  %s247_s24 = smov 96   ;;  %s248_s25 = smov 32  }
  0x13   :  { %53 = vrot.lane.b32.xlu0 %v27_v0, %s247_s24  ;;  %109 = vrot.lane.b32.xlu1 %v27_v0, %s248_s25  ;;  %s249_s26 = smov 64   ;;  %vm28_vm0 = vcmask 257024   ;;  %vm137_vm9 = vcmask 261120   ;;  %vm139_vm10 = vcmask 523264   ;;  %vm141_vm11 = vcmask 785408   ;;  %s250_s30 = smov [#allocation5]  }
  0x14   :  { %v29_v3 = vsel %vm28_vm0, %v27_v0, 0.0  ;;  %s166_s4 = sshll.u32 %s250_s30, 4  ;;  %s167_s4 = int_to_ptr.vmem [resolvable:$true] %s166_s4 }
  0x15   :  { %s220_s5 = scalar_lea.vmem %s167_s4, 64  ;;  %p225_p9 = scmp.lt.s32.totalorder %s167_s4, %s167_s4 }
  0x16   :  { %p221_p8 = scmp.ne.s32.totalorder %s167_s4, %s220_s5  ;;  %p226_p10 = scmp.lt.s32.totalorder %s220_s5, %s220_s5 }
  0x17   :  { %81 = vrot.lane.b32.xlu0 %v27_v0, %s249_s26 }
  0x18   :  { %p227_p11 = por %p226_p10, %p225_p9 }
  0x1a   :  { %p228_p12 = pnand %p227_p11, %p221_p8 }
  0x85   :  { %v54_v1 = vpop.permute.xlu0 %53  ;;  %v110_v5 = vpop.permute.xlu1 %109 }
  0x86   :  { %v56_v2 = vsel %vm28_vm0, %v54_v1, 0.0  ;;  %v112_v7 = vsel %vm28_vm0, %v110_v5, 0.0 }
  0x87   :  { %57 = vadd.xlane.f32.xlu1 %v56_v2 }
  0x89   :  { %v82_v4 = vpop.permute.xlu0 %81 }
  0x8a   :  { %v84_v6 = vsel %vm28_vm0, %v82_v4, 0.0 }
  0x8b   :  { %85 = vadd.xlane.f32.xlu0 %v84_v6  ;;  %30 = vadd.xlane.f32.xlu1 %v29_v3 }
  0x8f   :  { %113 = vadd.xlane.f32.xlu0 %v112_v7 }
 0x114   :  { %v58_v8 = vpop.xlane.xlu1 %57 }
 0x115   :  { %v59_v9 = vmul.f32 0.03125, %v58_v8  ;;  %v175_v8 = vld [vmem:[%s330_s1] ss:$0 sm:$0xff] }
 0x117   :  { %v287_v10 = vsub.f32 %v27_v0, %v59_v9 }
 0x118   :  { %v86_v11 = vpop.xlane.xlu0 %85  ;;  %v31_v20 = vpop.xlane.xlu1 %30 }
 0x119   :  { %v87_v12 = vmul.f32 0.03125, %v86_v11  ;;  %v61_v13 = vmul.f32 %v287_v10, %v287_v10  ;;  %v33_v21 = vmul.f32 0.03125, %v31_v20 }
 0x11b   :  { %v291_v14 = vsub.f32 %v27_v0, %v87_v12  ;;  %63 = vrot.lane.b32.xlu0 %v61_v13, %s247_s24  ;;  %v299_v22 = vsub.f32 %v27_v0, %v33_v21 }
 0x11c   :  { %v114_v15 = vpop.xlane.xlu0 %113 }
 0x11d   :  { %v115_v16 = vmul.f32 0.03125, %v114_v15  ;;  %v89_v17 = vmul.f32 %v291_v14, %v291_v14  ;;  %v35_v23 = vmul.f32 %v299_v22, %v299_v22 }
 0x11f   :  { %v295_v18 = vsub.f32 %v27_v0, %v115_v16  ;;  %91 = vrot.lane.b32.xlu1 %v89_v17, %s249_s26  ;;  %v36_v24 = vsel %vm28_vm0, %v35_v23, 0.0 }
 0x121   :  { %v117_v19 = vmul.f32 %v295_v18, %v295_v18 }
 0x123   :  { %119 = vrot.lane.b32.xlu1 %v117_v19, %s248_s25 }
 0x13a   :  { %37 = vadd.xlane.f32.xlu0 %v36_v24 }
 0x18d   :  { %v64_v25 = vpop.permute.xlu0 %63 }
 0x18e   :  { %v66_v26 = vsel %vm28_vm0, %v64_v25, 0.0 }
 0x18f   :  { %67 = vadd.xlane.f32.xlu1 %v66_v26 }
 0x191   :  { %v92_v27 = vpop.permute.xlu1 %91 }
 0x192   :  { %v94_v28 = vsel %vm28_vm0, %v92_v27, 0.0 }
 0x193   :  { %95 = vadd.xlane.f32.xlu0 %v94_v28 }
 0x195   :  { %v120_v29 = vpop.permute.xlu1 %119 }
 0x196   :  { %v122_v30 = vsel %vm28_vm0, %v120_v29, 0.0 }
 0x197   :  { %123 = vadd.xlane.f32.xlu0 %v122_v30 }
 0x1c7   :  { %v38_v31 = vpop.xlane.xlu0 %37 }
 0x1c8   :  { %v40_v32 = vmul.f32 0.032258064, %v38_v31 }
 0x1ca   :  { %182 = vrsqrt.f32 %v40_v32  ;;  %vm43_vm1 = vcmp.eq.f32.partialorder %v40_v32, inf  ;;  %v46_v41 = vand.u32 2147483648, %v40_v32  ;;  %vm45_vm2 = vcmp.eq.f32.partialorder %v40_v32, 0.0 }
 0x1d4   :  { %v183_v37 = vpop.eup %182 }
 0x1d5   :  { %v42_v39 = vmul.f32 %v183_v37, %v40_v32 }
 0x1d7   :  { %v44_v43 = vsel %vm43_vm1, %v40_v32, %v42_v39 }
 0x1d8   :  { %v47_v46 = vsel %vm45_vm2, %v46_v41, %v44_v43 }
 0x1d9   :  { %v48_v52 = vadd.f32 1e-07, %v47_v46 }
 0x21c   :  { %v68_v33 = vpop.xlane.xlu1 %67 }
 0x21d   :  { %v69_v34 = vmul.f32 0.032258064, %v68_v33 }
 0x21f   :  { %184 = vrsqrt.f32 %v69_v34  ;;  %vm72_vm3 = vcmp.eq.f32.partialorder %v69_v34, inf  ;;  %v75_v45 = vand.u32 2147483648, %v69_v34  ;;  %vm74_vm4 = vcmp.eq.f32.partialorder %v69_v34, 0.0 }
 0x220   :  { %v96_v35 = vpop.xlane.xlu0 %95 }
 0x221   :  { %v97_v36 = vmul.f32 0.032258064, %v96_v35 }
 0x223   :  { %186 = vrsqrt.f32 %v97_v36  ;;  %vm100_vm5 = vcmp.eq.f32.partialorder %v97_v36, inf  ;;  %v103_v53 = vand.u32 2147483648, %v97_v36  ;;  %vm102_vm6 = vcmp.eq.f32.partialorder %v97_v36, 0.0 }
 0x224   :  { %v124_v38 = vpop.xlane.xlu0 %123 }
 0x225   :  { %v125_v40 = vmul.f32 0.032258064, %v124_v38 }
 0x227   :  { %188 = vrsqrt.f32 %v125_v40  ;;  %vm128_vm7 = vcmp.eq.f32.partialorder %v125_v40, inf  ;;  %v131_v59 = vand.u32 2147483648, %v125_v40  ;;  %vm130_vm8 = vcmp.eq.f32.partialorder %v125_v40, 0.0 }
 0x229   :  { %v185_v42 = vpop.eup %184 }
 0x22a   :  { %v71_v44 = vmul.f32 %v185_v42, %v69_v34 }
 0x22c   :  { %v73_v47 = vsel %vm72_vm3, %v69_v34, %v71_v44 }
 0x22d   :  { %v187_v48 = vpop.eup %186  ;;  %v76_v49 = vsel %vm74_vm4, %v75_v45, %v73_v47 }
 0x22e   :  { %v77_v50 = vadd.f32 1e-07, %v76_v49  ;;  %v99_v51 = vmul.f32 %v187_v48, %v97_v36 }
 0x230   :  { %v101_v54 = vsel %vm100_vm5, %v97_v36, %v99_v51  ;;  %190 = vrcp.f32 %v77_v50 }
 0x231   :  { %v189_v55 = vpop.eup %188  ;;  %v104_v56 = vsel %vm102_vm6, %v103_v53, %v101_v54  ;;  %192 = vrcp.f32 %v48_v52 }
 0x232   :  { %v105_v57 = vadd.f32 1e-07, %v104_v56  ;;  %v127_v58 = vmul.f32 %v189_v55, %v125_v40 }
 0x234   :  { %194 = vrcp.f32 %v105_v57  ;;  %v129_v60 = vsel %vm128_vm7, %v125_v40, %v127_v58 }
 0x235   :  { %v132_v61 = vsel %vm130_vm8, %v131_v59, %v129_v60 }
 0x236   :  { %v133_v62 = vadd.f32 1e-07, %v132_v61 }
 0x238   :  { %196 = vrcp.f32 %v133_v62 }
 0x23a   :  { %v191_v63 = vpop.eup %190 }
 0x23b   :  { %v193_v0 = vpop.eup %192  ;;  %v80_v2 = vmul.f32 %v191_v63, %v287_v10  ;;  %v176_v10 = vld [vmem:[%s331_s2] ss:$0 sm:$0xff] }
 0x23c   :  { %v51_v4 = vmul.f32 %v193_v0, %v299_v22 }
 0x23e   :  { %v195_v1 = vpop.eup %194  ;;  %v138_v7 = vsel %vm137_vm9, %v51_v4, %v80_v2 }
 0x23f   :  { %v108_v3 = vmul.f32 %v195_v1, %v291_v14 }
 0x241   :  { %v140_v9 = vsel %vm139_vm10, %v138_v7, %v108_v3 }
 0x242   :  { %v197_v5 = vpop.eup %196 }
 0x243   :  { %v136_v6 = vmul.f32 %v197_v5, %v295_v18 }
 0x245   :  { %v142_v11 = vsel %vm141_vm11, %v140_v9, %v136_v6 }
 0x246   :  { %v150_v12 = vmul.f32 %v175_v8, %v142_v11 }
 0x248   :  { %v158_v13 = vadd.f32 %v176_v10, %v150_v12 }
 0x24a   :  { %159 = vst [vmem:[#allocation5] sm:$0xf] %v158_v13 }
 0x24b   :  { %231 = shalt.err (!%p228_p12)
}
 0x24c   :  { %s232_s7 = scalar_lea.hbm %s332_s3, 64 }
 0x24d   :  { %p233_p13 = scmp.ne.s32.totalorder %s332_s3, %s232_s7  ;;  %p236_p0 = scmp.lt.u32.totalorder %s232_s7, %s332_s3 }
 0x24f   :  { %p238_p1 = pnand %p236_p0, %p233_p13 }
 0x251   :  { %241 = shalt.err (!%p238_p1)
}
 0x252   :  { %169 = dma.vmem_to_hbm [thread:$0]  %s167_s4, 64, %s332_s3, [#allocation4]  }
 0x253   :  { %244 = dma.done.wait [#allocation4], 64  }
 0x254   :  { %245 = vsyncadd [#allocation4], 4294967232 }
 0x255   :  { %173 = vsyncpa [#allocation3], 1 }
 0x256   :  { %174 = vsyncpa [#allocation4], 1 }

</bundles_post_ra>
